<compile_context>
chip_gen: v7x
topology: tpu7x:2x2x1
jax: 0.10.0
libtpu: 0.0.40
codegen_flags: <defaults>
</compile_context>

<pallas_src>
import functools

import jax
import jax.numpy as jnp
from jax.experimental import pallas as pl
from jax.experimental.pallas import tpu as pltpu

_VMEM_LIMIT_BYTES = 48 * 1024 * 1024  # > v5e 16 MiB scoped default, < v7x 64 MiB physical


def _round_up(x, m):
    return (x + m - 1) // m * m


# ---------------------------------------------------------------------------
# Path A: whole-graph fused kernel (both layers, A resident in VMEM).
#   Used when the padded bf16 A comfortably fits in VMEM (n_pad <= 2048).
#   A is DMA'd from HBM exactly once for the whole forward pass.
# ---------------------------------------------------------------------------
def _gcn_fused_kernel(a_ref, x_ref, w1_ref, b1_ref, w2_ref, b2_ref, o_ref):
    bf16 = jnp.bfloat16
    a = a_ref[...]
    # layer 1: H = relu(A @ (X @ W1) + b1)
    xw1 = jnp.dot(x_ref[...], w1_ref[...],
                  preferred_element_type=jnp.float32).astype(bf16)
    h = jnp.maximum(
        jnp.dot(a, xw1, preferred_element_type=jnp.float32) + b1_ref[...], 0.0
    ).astype(bf16)
    # dropout(p=0.5, training=False) -> identity
    # layer 2: OUT = A @ (H @ W2) + b2
    hw2 = jnp.dot(h, w2_ref[...],
                  preferred_element_type=jnp.float32).astype(bf16)
    o_ref[...] = jnp.dot(a, hw2, preferred_element_type=jnp.float32) + b2_ref[...]


def _gcn_fused_call(a_p, x_p, w1_p, b1_p, w2_p, b2_p):
    n_pad = a_p.shape[0]
    o_pad = w2_p.shape[1]
    return pl.pallas_call(
        _gcn_fused_kernel,
        out_shape=jax.ShapeDtypeStruct((n_pad, o_pad), jnp.float32),
        compiler_params=pltpu.CompilerParams(
            vmem_limit_bytes=_VMEM_LIMIT_BYTES,
        ),
    )(a_p, x_p, w1_p, b1_p, w2_p, b2_p)


# ---------------------------------------------------------------------------
# Path B: gridded per-layer kernel   OUT = maybe_relu(A @ (X @ W) + bias)
#   grid = (row tiles of A, K tiles of A); f32 accumulator in VMEM scratch.
#   The X@W feature transform is computed in-kernel per K window (extra MXU
#   work is hidden behind the A HBM stream, which is the bottleneck).
# ---------------------------------------------------------------------------
def _gcn_layer_kernel(a_ref, x_ref, w_ref, b_ref, o_ref, acc_ref, *,
                      apply_relu, x_resident):
    k = pl.program_id(1)
    tk = a_ref.shape[1]

    @pl.when(k == 0)
    def _init():
        acc_ref[...] = jnp.zeros_like(acc_ref)

    if x_resident:
        # X lives whole in VMEM (constant index map -> fetched once);
        # slice the current K window out of it.
        start = pl.multiple_of(k * tk, tk)
        x_blk = x_ref[pl.ds(start, tk), :]
    else:
        x_blk = x_ref[...]

    xw = jnp.dot(x_blk, w_ref[...],
                 preferred_element_type=jnp.float32).astype(a_ref.dtype)
    acc_ref[...] += jnp.dot(a_ref[...], xw, preferred_element_type=jnp.float32)

    # Bias + ReLU hoisted out of the reduction loop: only on the last K step.
    @pl.when(k == pl.num_programs(1) - 1)
    def _finalize():
        res = acc_ref[...] + b_ref[...]
        if apply_relu:
            res = jnp.maximum(res, 0.0)
        o_ref[...] = res.astype(o_ref.dtype)


def _gcn_layer_tiled(a_p, x_p, w_p, b_p, *, apply_relu, out_dtype, tm, tk,
                     x_resident_limit_bytes=2 * 1024 * 1024):
    n_pad = a_p.shape[0]
    in_c = x_p.shape[1]
    p = w_p.shape[1]

    # Keep the layer input fully VMEM-resident when small (DMA'd once; the
    # kernel then streams only A tiles); otherwise stream (tk, in_c) windows.
    x_resident = (x_p.size * x_p.dtype.itemsize) <= x_resident_limit_bytes
    if x_resident:
        x_spec = pl.BlockSpec((n_pad, in_c), lambda i, k: (0, 0))
    else:
        x_spec = pl.BlockSpec((tk, in_c), lambda i, k: (k, 0))

    kernel = functools.partial(
        _gcn_layer_kernel, apply_relu=apply_relu, x_resident=x_resident)

    return pl.pallas_call(
        kernel,
        out_shape=jax.ShapeDtypeStruct((n_pad, p), out_dtype),
        grid_spec=pltpu.PrefetchScalarGridSpec(
            num_scalar_prefetch=0,
            grid=(n_pad // tm, n_pad // tk),
            in_specs=[
                pl.BlockSpec((tm, tk), lambda i, k: (i, k)),   # stream A tiles
                x_spec,
                pl.BlockSpec((in_c, p), lambda i, k: (0, 0)),  # W resident (tiny)
                pl.BlockSpec((1, p), lambda i, k: (0, 0)),     # bias resident
            ],
            out_specs=pl.BlockSpec((tm, p), lambda i, k: (i, 0)),
            scratch_shapes=[pltpu.VMEM((tm, p), jnp.float32)],
        ),
        compiler_params=pltpu.CompilerParams(
            dimension_semantics=("parallel", "arbitrary"),
            vmem_limit_bytes=_VMEM_LIMIT_BYTES,
        ),
    )(a_p, x_p, w_p, b_p)


def _choose_tiles(n):
    """Row / K tile sizes for the gridded path (>=2 row tiles for megacore)."""
    if n <= 1024:
        n_pad = _round_up(n, 256)
        tm = 256 if n_pad >= 512 else 128
        tk = tm
    else:
        n_pad = _round_up(n, 512)
        tm = 512
        tk = 1024 if n_pad % 1024 == 0 else 512   # 1 MiB bf16 A tiles when possible
    return n_pad, tm, tk


# ---------------------------------------------------------------------------
# Full GCN forward (inference): conv1 -> relu -> dropout(id) -> conv2
# ---------------------------------------------------------------------------
def gcn_forward(a_norm, x, w1, b1, w2, b2, *, force_tiled=False):
    n, in_c = x.shape
    hid_c = w1.shape[1]
    out_c = w2.shape[1]

    bf16, f32 = jnp.bfloat16, jnp.float32
    h_pad = _round_up(hid_c, 128)
    o_pad = _round_up(out_c, 128)

    n_pad_fused = _round_up(n, 128)
    use_fused = (not force_tiled) and (n_pad_fused <= 2048)

    if use_fused:
        n_pad, tm, tk = n_pad_fused, None, None
    else:
        n_pad, tm, tk = _choose_tiles(n)

    # Pad / cast.  A is cast to bf16 *before* padding so no f32 n_pad^2
    # intermediate is materialized.  Feature dims stay unpadded; only output
    # channel dims are padded to 128 (lane-dense stores).  NOTE: for a static
    # graph this prep is constant across calls and would be hoisted out of the
    # per-forward path in production.
    pad_n = n_pad - n
    a_p = jnp.pad(a_norm.astype(bf16), ((0, pad_n), (0, pad_n)))
    x_p = jnp.pad(x.astype(bf16), ((0, pad_n), (0, 0)))
    w1_p = jnp.pad(w1.astype(bf16), ((0, 0), (0, h_pad - hid_c)))
    b1_p = jnp.pad(jnp.reshape(b1, (1, -1)).astype(f32),
                   ((0, 0), (0, h_pad - hid_c)))
    w2_p = jnp.pad(w2.astype(bf16), ((0, h_pad - hid_c), (0, o_pad - out_c)))
    b2_p = jnp.pad(jnp.reshape(b2, (1, -1)).astype(f32),
                   ((0, 0), (0, o_pad - out_c)))

    if use_fused:
        out = _gcn_fused_call(a_p, x_p, w1_p, b1_p, w2_p, b2_p)
    else:
        # layer 1: H = relu(A @ (X @ W1) + b1)
        h = _gcn_layer_tiled(a_p, x_p, w1_p, b1_p,
                             apply_relu=True, out_dtype=bf16, tm=tm, tk=tk)
        # dropout(p=0.5, training=False) -> identity
        # layer 2: OUT = A @ (H @ W2) + b2
        out = _gcn_layer_tiled(a_p, h, w2_p, b2_p,
                               apply_relu=False, out_dtype=f32, tm=tm, tk=tk)

    return out[:n, :out_c]


# ---------------------------------------------------------------------------
# Plain-JAX glue + reference
# ---------------------------------------------------------------------------
def build_normalized_adjacency(edge_index, num_nodes):
    """Dense GCN normalization D^-1/2 (A + I) D^-1/2."""
    src, dst = edge_index[0], edge_index[1]
    a = jnp.zeros((num_nodes, num_nodes), dtype=jnp.float32)
    a = a.at[dst, src].set(1.0)                 # message src -> dst (row = target)
    diag = jnp.arange(num_nodes)
    a = a.at[diag, diag].set(1.0)               # self-loops
    deg = a.sum(axis=1)
    d_inv_sqrt = 1.0 / jnp.sqrt(jnp.maximum(deg, 1e-12))
    return d_inv_sqrt[:, None] * a * d_inv_sqrt[None, :]


def reference_forward(a_norm, x, w1, b1, w2, b2, compute_dtype=jnp.float32):
    """Pure-JAX reference; compute_dtype mirrors the kernel's MXU input cast."""
    cd, f32 = compute_dtype, jnp.float32
    q = lambda t: t.astype(cd).astype(f32)
    a, xq, w1q, w2q = q(a_norm), q(x), q(w1), q(w2)
    b1r = jnp.reshape(b1, (1, -1)).astype(f32)
    b2r = jnp.reshape(b2, (1, -1)).astype(f32)
    xw1 = q(xq @ w1q)
    h = q(jnp.maximum(a @ xw1 + b1r, 0.0))
    hw2 = q(h @ w2q)
    return a @ hw2 + b2r


if __name__ == "__main__":
    N = 256           # nodes
    IN_C = 8          # in_channels
    HID_C = 32        # hidden_channels
    OUT_C = 4         # out_channels

    key = jax.random.PRNGKey(0)
    k_x, k_w1, k_w2 = jax.random.split(key, 3)

    # node features
    x = jax.random.normal(k_x, (N, IN_C), dtype=jnp.float32)

    # deterministic undirected ring graph + chords, stored as edge_index [2, E]
    src_list, dst_list = [], []
    for i in range(N):
        for j in (i + 1, i + 3):
            u, v = i, j % N
            src_list += [u, v]
            dst_list += [v, u]
    edge_index = jnp.array([src_list, dst_list], dtype=jnp.int32)   # [2, E]

    a_norm = build_normalized_adjacency(edge_index, N)

    # GCNConv params (torch_geometric layout: weight [in, out], bias [out])
    w1 = jax.random.normal(k_w1, (IN_C, HID_C), dtype=jnp.float32) * (1.0 / jnp.sqrt(IN_C))
    b1 = jnp.zeros((HID_C,), dtype=jnp.float32)
    w2 = jax.random.normal(k_w2, (HID_C, OUT_C), dtype=jnp.float32) * (1.0 / jnp.sqrt(HID_C))
    b2 = jnp.zeros((OUT_C,), dtype=jnp.float32)

    gcn = jax.jit(gcn_forward, static_argnames=("force_tiled",))

    # References: bf16-quantized (tight) and pure-f32 module semantics (loose).
    ref_bf16 = reference_forward(a_norm, x, w1, b1, w2, b2, compute_dtype=jnp.bfloat16)
    ref_f32 = reference_forward(a_norm, x, w1, b1, w2, b2)

    # Path A: fused single-kernel (A resident in VMEM, read from HBM once).
    out_fused = jax.block_until_ready(gcn(a_norm, x, w1, b1, w2, b2))
    assert out_fused.shape == (N, OUT_C)
    assert bool(jnp.all(jnp.isfinite(out_fused)))
    assert jnp.allclose(out_fused, ref_bf16, atol=1e-2, rtol=1e-2), \
        float(jnp.max(jnp.abs(out_fused - ref_bf16)))
    assert jnp.allclose(out_fused, ref_f32, atol=7e-2, rtol=7e-2), \
        float(jnp.max(jnp.abs(out_fused - ref_f32)))

    # Path B: gridded per-layer kernels (exercised via force_tiled on the same graph).
    out_tiled = jax.block_until_ready(
        gcn(a_norm, x, w1, b1, w2, b2, force_tiled=True))
    assert out_tiled.shape == (N, OUT_C)
    assert bool(jnp.all(jnp.isfinite(out_tiled)))
    assert jnp.allclose(out_tiled, ref_bf16, atol=1e-2, rtol=1e-2), \
        float(jnp.max(jnp.abs(out_tiled - ref_bf16)))
    assert jnp.allclose(out_tiled, ref_f32, atol=7e-2, rtol=7e-2), \
        float(jnp.max(jnp.abs(out_tiled - ref_f32)))

    print("KERNEL_OK")
</pallas_src>

<mosaic_0001>
module attributes {stable_mosaic.version = 11 : i64} {
  func.func @_gcn_fused_kernel(%arg0: memref<256x256xbf16, #tpu.memory_space<vmem>>, %arg1: memref<256x8xbf16, #tpu.memory_space<vmem>>, %arg2: memref<8x128xbf16, #tpu.memory_space<vmem>>, %arg3: memref<1x128xf32, #tpu.memory_space<vmem>>, %arg4: memref<128x128xbf16, #tpu.memory_space<vmem>>, %arg5: memref<1x128xf32, #tpu.memory_space<vmem>>, %arg6: memref<256x128xf32, #tpu.memory_space<vmem>>) attributes {dimension_semantics = [], scalar_prefetch = 0 : i64, scratch_operands = 0 : i64, tpu.core_type = #tpu.core_type<tc>} {
    %c0 = arith.constant 0 : index
    %c0_0 = arith.constant 0 : index
    %0 = vector.load %arg0[%c0, %c0_0] : memref<256x256xbf16, #tpu.memory_space<vmem>>, vector<256x256xbf16>
    %c0_1 = arith.constant 0 : index
    %c0_2 = arith.constant 0 : index
    %1 = vector.load %arg1[%c0_1, %c0_2] : memref<256x8xbf16, #tpu.memory_space<vmem>>, vector<256x8xbf16>
    %c0_3 = arith.constant 0 : index
    %c0_4 = arith.constant 0 : index
    %2 = vector.load %arg2[%c0_3, %c0_4] : memref<8x128xbf16, #tpu.memory_space<vmem>>, vector<8x128xbf16>
    %cst = arith.constant dense<0.000000e+00> : vector<256x128xf32>
    %3 = tpu.matmul %1, %2, %cst {dimension_numbers = #tpu.dot_dimension_numbers<[1], [0], [0], [1], [0, 0, 1, 1], [], []>} : vector<256x8xbf16>, vector<8x128xbf16>, vector<256x128xf32> -> vector<256x128xf32>
    %4 = arith.truncf %3 : vector<256x128xf32> to vector<256x128xbf16>
    %cst_5 = arith.constant dense<0.000000e+00> : vector<256x128xf32>
    %5 = tpu.matmul %0, %4, %cst_5 {dimension_numbers = #tpu.dot_dimension_numbers<[1], [0], [0], [1], [0, 0, 1, 1], [], []>} : vector<256x256xbf16>, vector<256x128xbf16>, vector<256x128xf32> -> vector<256x128xf32>
    %c0_6 = arith.constant 0 : index
    %c0_7 = arith.constant 0 : index
    %6 = vector.load %arg3[%c0_6, %c0_7] : memref<1x128xf32, #tpu.memory_space<vmem>>, vector<1x128xf32>
    %7 = vector.broadcast %6 : vector<1x128xf32> to vector<256x128xf32>
    %8 = arith.addf %5, %7 : vector<256x128xf32>
    %cst_8 = arith.constant 0.000000e+00 : f32
    %9 = vector.broadcast %cst_8 : f32 to vector<256x128xf32>
    %10 = arith.maximumf %8, %9 : vector<256x128xf32>
    %11 = arith.truncf %10 : vector<256x128xf32> to vector<256x128xbf16>
    %c0_9 = arith.constant 0 : index
    %c0_10 = arith.constant 0 : index
    %12 = vector.load %arg4[%c0_9, %c0_10] : memref<128x128xbf16, #tpu.memory_space<vmem>>, vector<128x128xbf16>
    %cst_11 = arith.constant dense<0.000000e+00> : vector<256x128xf32>
    %13 = tpu.matmul %11, %12, %cst_11 {dimension_numbers = #tpu.dot_dimension_numbers<[1], [0], [0], [1], [0, 0, 1, 1], [], []>} : vector<256x128xbf16>, vector<128x128xbf16>, vector<256x128xf32> -> vector<256x128xf32>
    %14 = arith.truncf %13 : vector<256x128xf32> to vector<256x128xbf16>
    %cst_12 = arith.constant dense<0.000000e+00> : vector<256x128xf32>
    %15 = tpu.matmul %0, %14, %cst_12 {dimension_numbers = #tpu.dot_dimension_numbers<[1], [0], [0], [1], [0, 0, 1, 1], [], []>} : vector<256x256xbf16>, vector<256x128xbf16>, vector<256x128xf32> -> vector<256x128xf32>
    %c0_13 = arith.constant 0 : index
    %c0_14 = arith.constant 0 : index
    %16 = vector.load %arg5[%c0_13, %c0_14] : memref<1x128xf32, #tpu.memory_space<vmem>>, vector<1x128xf32>
    %17 = vector.broadcast %16 : vector<1x128xf32> to vector<256x128xf32>
    %18 = arith.addf %15, %17 : vector<256x128xf32>
    %c0_15 = arith.constant 0 : index
    %c0_16 = arith.constant 0 : index
    %19 = vector.load %arg6[%c0_15, %c0_16] : memref<256x128xf32, #tpu.memory_space<vmem>>, vector<256x128xf32>
    tpu.vector_store %arg6[%c0_15, %c0_16], %18 {strides = array<i32>} : memref<256x128xf32, #tpu.memory_space<vmem>>, vector<256x128xf32>,
    return
  }
}

</mosaic_0001>

<bundles_post_ra>
// kernel: gcn_forward.1
= control target key start
LH: loop header
LB: loop body
LE: loop exit
PB: predicated region body
PF: predicated region fallthrough
CT: control target
= control target key end

     0   :  { %vm218_vm0 = vcmask 1043456   ;;  %vm169_vm1 = vcmask 64512   ;;  %s2246_s2 = inlined_call_operand.vmem [shape: bf16[8,128], index: 2, kind: input, shape index: {}]   ;;  %s2247_s1 = inlined_call_operand.vmem [shape: bf16[256,8], index: 1, kind: input, shape index: {}]   ;;  %s2248_s0 = inlined_call_operand.vmem [shape: bf16[256,256], index: 0, kind: input, shape index: {}]   ;;  %s2249_s4 = inlined_call_operand.vmem [shape: bf16[128,128], index: 4, kind: input, shape index: {}]   ;;  %s2250_s3 = inlined_call_operand.vmem [shape: f32[1,128], index: 3, kind: input, shape index: {}]   ;;  %s2251_s5 = inlined_call_operand.vmem [shape: f32[1,128], index: 5, kind: input, shape index: {}]   ;;  %s2252_s6 = inlined_call_operand.vmem [shape: f32[256,128], index: 6, kind: output, shape index: {}]  }
   0x1   :  { %v88_v0 = vld [vmem:[%s2246_s2] sm:$0xf]  ;;  %v1659_v3 = vld [vmem:[%s2247_s1 + $0x8] sm:$0xff]   ;;  %v1660_v4 = vld [vmem:[%s2247_s1 + $0x10] sm:$0xff]  }
   0x2   :  { %1657 = vmatprep.subr.msk.bf16.mxu0 %vm218_vm0, %v88_v0  ;;  %v220_v1 = vsel %vm218_vm0, %v88_v0, 0  ;;  %v1658_v2 = vld [vmem:[%s2247_s1] sm:$0xff]   ;;  %v1661_v5 = vld [vmem:[%s2247_s1 + $0x18] sm:$0xff]   ;;  %v1663_v7 = vld [vmem:[%s2247_s1 + $0x28] sm:$0xff]  }
   0x3   :  { %1560 = vmatpush3.bf16.msra.mxu0 %v220_v1  ;;  %1561 = vmatprep.mubr.msk.bf16.mxu0 %vm169_vm1, %v1658_v2  ;;  %v1662_v6 = vld [vmem:[%s2247_s1 + $0x20] sm:$0xff]   ;;  %v1664_v8 = vld [vmem:[%s2247_s1 + $0x30] sm:$0xff]   ;;  %v1665_v9 = vld [vmem:[%s2247_s1 + $0x38] sm:$0xff]  }
   0x4   :  { %v1666_v10 = vld [vmem:[%s2247_s1 + $0x40] sm:$0xff]   ;;  %v1667_v11 = vld [vmem:[%s2247_s1 + $0x48] sm:$0xff]   ;;  %v1668_v12 = vld [vmem:[%s2247_s1 + $0x50] sm:$0xff]  }
   0x5   :  { %v1669_v13 = vld [vmem:[%s2247_s1 + $0x58] sm:$0xff]   ;;  %v1670_v14 = vld [vmem:[%s2247_s1 + $0x60] sm:$0xff]   ;;  %v1671_v15 = vld [vmem:[%s2247_s1 + $0x68] sm:$0xff]  }
   0x6   :  { %1562 = vmatmul.mubr.msk.bf16.vlgmr.msra.gmra.mrb[0].mxu0 %vm169_vm1, %v1659_v3  ;;  %v1672_v16 = vld [vmem:[%s2247_s1 + $0x70] sm:$0xff]   ;;  %v1673_v17 = vld [vmem:[%s2247_s1 + $0x78] sm:$0xff]   ;;  %v1835_v18 = vld [vmem:[%s2248_s0 + $0x4] ss:$8 sps:$4 sm:$0xff]  }
   0x7   :  { %1565 = vmatprep.mubr.msk.bf16.mxu0 %vm169_vm1, %v1660_v4  ;;  %598 = vmatprep.mubr.bf16.mxu1 %v1835_v18  ;;  %v1722_v3 = vld [vmem:[%s2249_s4] sm:$0xff]  }
   0x8   :  { %v1844_v4 = vld [vmem:[%s2248_s0] ss:$8 sps:$4 sm:$0xff]   ;;  %1593 = vmatprep.subr.bf16.mxu0 %v1722_v3 }
   0x9   :  { %1594 = vmatpush3.bf16.msra.mxu0 %v1722_v3 }
   0xe   :  { %1566 = vmatmul.mubr.msk.bf16.gmra.mrb[4].mxu0 %vm169_vm1, %v1661_v5  ;;  %v1723_v5 = vld [vmem:[%s2249_s4 + $0x8] sm:$0xff]  }
   0xf   :  { %1569 = vmatprep.mubr.msk.bf16.mxu0 %vm169_vm1, %v1662_v6  ;;  %v1852_v6 = vld [vmem:[%s2248_s0 + $0x14] ss:$8 sps:$4 sm:$0xff]   ;;  %1595 = vmatprep.subr.bf16.mxu0 %v1723_v5 }
  0x10   :  { %1596 = vmatpush3.bf16.msra.mxu0 %v1723_v5 }
  0x16   :  { %1570 = vmatmul.mubr.msk.bf16.gmra.mrb[8].mxu0 %vm169_vm1, %v1663_v7  ;;  %v1724_v7 = vld [vmem:[%s2249_s4 + $0x10] sm:$0xff]  }
  0x17   :  { %1573 = vmatprep.mubr.msk.bf16.mxu0 %vm169_vm1, %v1664_v8  ;;  %1597 = vmatprep.subr.bf16.mxu0 %v1724_v7  ;;  %v1862_v8 = vld [vmem:[%s2248_s0 + $0x10] ss:$8 sps:$4 sm:$0xff]  }
  0x18   :  { %1598 = vmatpush3.bf16.msra.mxu0 %v1724_v7 }
  0x1e   :  { %1574 = vmatmul.mubr.msk.bf16.gmra.mrb[12].mxu0 %vm169_vm1, %v1665_v9  ;;  %v1867_v9 = vld [vmem:[%s2248_s0 + $0x24] ss:$8 sps:$4 sm:$0xff]  }
  0x1f   :  { %1577 = vmatprep.mubr.msk.bf16.mxu0 %vm169_vm1, %v1666_v10  ;;  %v1874_v10 = vld [vmem:[%s2248_s0 + $0x20] ss:$8 sps:$4 sm:$0xff]  }
  0x26   :  { %1578 = vmatmul.mubr.msk.bf16.gmra.mrb[16].mxu0 %vm169_vm1, %v1667_v11  ;;  %v1879_v11 = vld [vmem:[%s2248_s0 + $0x34] ss:$8 sps:$4 sm:$0xff]  }
  0x27   :  { %1581 = vmatprep.mubr.msk.bf16.mxu0 %vm169_vm1, %v1668_v12  ;;  %v1886_v12 = vld [vmem:[%s2248_s0 + $0x30] ss:$8 sps:$4 sm:$0xff]  }
  0x2e   :  { %1582 = vmatmul.mubr.msk.bf16.gmra.mrb[20].mxu0 %vm169_vm1, %v1669_v13  ;;  %v1891_v13 = vld [vmem:[%s2248_s0 + $0x44] ss:$8 sps:$4 sm:$0xff]  }
  0x2f   :  { %1585 = vmatprep.mubr.msk.bf16.mxu0 %vm169_vm1, %v1670_v14  ;;  %v1898_v14 = vld [vmem:[%s2248_s0 + $0x40] ss:$8 sps:$4 sm:$0xff]  }
  0x36   :  { %1586 = vmatmul.mubr.msk.bf16.gmra.mrb[24].mxu0 %vm169_vm1, %v1671_v15  ;;  %v1903_v15 = vld [vmem:[%s2248_s0 + $0x54] ss:$8 sps:$4 sm:$0xff]  }
  0x37   :  { %1589 = vmatprep.mubr.msk.bf16.mxu0 %vm169_vm1, %v1672_v16  ;;  %v1910_v16 = vld [vmem:[%s2248_s0 + $0x50] ss:$8 sps:$4 sm:$0xff]  }
  0x3e   :  { %1590 = vmatmul.mubr.msk.bf16.gmra.mrb[28].mxu0 %vm169_vm1, %v1673_v17  ;;  %v1915_v17 = vld [vmem:[%s2248_s0 + $0x64] ss:$8 sps:$4 sm:$0xff]  }
  0xd9   :  { %v1563_v19 = vpop.f32.mrb[0].mxu0 }
  0xda   :  { %v256_v20 = vpop.f32.mrb[1].mxu0 }
  0xdb   :  { %v1564_v21 = vpop.f32.mrb[2].mxu0 }
  0xdc   :  { %v384_v22 = vpack.c.bf16 %v1564_v21, %v1563_v19  ;;  %v259_v23 = vpop.f32.mrb[3].mxu0  ;;  %v1922_v19 = vld [vmem:[%s2248_s0 + $0x60] ss:$8 sps:$4 sm:$0xff]   ;;  %v1934_v21 = vld [vmem:[%s2248_s0 + $0x70] ss:$8 sps:$4 sm:$0xff]  }
  0xdd   :  { %v383_v24 = vpack.c.bf16 %v259_v23, %v256_v20  ;;  %v1927_v20 = vld [vmem:[%s2248_s0 + $0x74] ss:$8 sps:$4 sm:$0xff]   ;;  %v1946_v23 = vld [vmem:[%s2248_s0 + $0x80] ss:$8 sps:$4 sm:$0xff]  }
  0xe1   :  { %v1567_v25 = vpop.f32.mrb[4].mxu0 }
  0xe2   :  { %v272_v26 = vpop.f32.mrb[5].mxu0 }
  0xe3   :  { %v1568_v27 = vpop.f32.mrb[6].mxu0 }
  0xe4   :  { %v386_v28 = vpack.c.bf16 %v1568_v27, %v1567_v25  ;;  %v275_v29 = vpop.f32.mrb[7].mxu0  ;;  %v1958_v25 = vld [vmem:[%s2248_s0 + $0x90] ss:$8 sps:$4 sm:$0xff]   ;;  %v1967_v27 = vld [vmem:[%s2248_s0 + $0xa0] ss:$8 sps:$4 sm:$0xff]  }
  0xe5   :  { %v385_v30 = vpack.c.bf16 %v275_v29, %v272_v26  ;;  %v1704_v26 = vld [vmem:[%s2248_s0 + $0xa4] ss:$8 sps:$4 sm:$0xff]   ;;  %v1725_v29 = vld [vmem:[%s2249_s4 + $0x18] sm:$0xff]  }
  0xe6   :  { %1599 = vmatprep.subr.bf16.mxu0 %v1725_v29 }
  0xe7   :  { %1600 = vmatpush3.bf16.msra.mxu0 %v1725_v29 }
  0xe9   :  { %v1571_v31 = vpop.f32.mrb[8].mxu0 }
  0xea   :  { %v288_v32 = vpop.f32.mrb[9].mxu0 }
  0xeb   :  { %v1572_v33 = vpop.f32.mrb[10].mxu0 }
  0xec   :  { %v388_v34 = vpack.c.bf16 %v1572_v33, %v1571_v31  ;;  %v291_v35 = vpop.f32.mrb[11].mxu0  ;;  %v1987_v31 = vld [vmem:[%s2248_s0 + $0xc4] ss:$8 sps:$4 sm:$0xff]  }
  0xed   :  { %v387_v36 = vpack.c.bf16 %v291_v35, %v288_v32  ;;  %v1726_v32 = vld [vmem:[%s2249_s4 + $0x20] sm:$0xff]   ;;  %v1727_v33 = vld [vmem:[%s2249_s4 + $0x28] sm:$0xff]   ;;  %v2005_v35 = vld [vmem:[%s2248_s0 + $0xd4] ss:$8 sps:$4 sm:$0xff]  }
  0xee   :  { %1601 = vmatprep.subr.bf16.mxu0 %v1726_v32 }
  0xef   :  { %1602 = vmatpush3.bf16.msra.mxu0 %v1726_v32 }
  0xf0   :  { %1603 = vmatprep.subr.bf16.mxu0 %v1727_v33 }
  0xf1   :  { %v1575_v37 = vpop.f32.mrb[12].mxu0 }
  0xf2   :  { %v304_v38 = vpop.f32.mrb[13].mxu0 }
  0xf3   :  { %v1576_v39 = vpop.f32.mrb[14].mxu0  ;;  %1604 = vmatpush3.bf16.msra.mxu0 %v1727_v33 }
  0xf4   :  { %v390_v40 = vpack.c.bf16 %v1576_v39, %v1575_v37  ;;  %v307_v41 = vpop.f32.mrb[15].mxu0  ;;  %v1729_v37 = vld [vmem:[%s2249_s4 + $0x38] sm:$0xff]   ;;  %v2023_v39 = vld [vmem:[%s2248_s0 + $0xe4] ss:$8 sps:$4 sm:$0xff]  }
  0xf5   :  { %v389_v42 = vpack.c.bf16 %v307_v41, %v304_v38  ;;  %v2018_v38 = vld [vmem:[%s2248_s0 + $0xd0] ss:$8 sps:$4 sm:$0xff]   ;;  %v2035_v41 = vld [vmem:[%s2248_s0 + $0xf4] ss:$8 sps:$4 sm:$0xff]  }
  0xf9   :  { %v1579_v43 = vpop.f32.mrb[16].mxu0 }
  0xfa   :  { %v320_v44 = vpop.f32.mrb[17].mxu0 }
  0xfb   :  { %v1580_v45 = vpop.f32.mrb[18].mxu0 }
  0xfc   :  { %v392_v46 = vpack.c.bf16 %v1580_v45, %v1579_v43  ;;  %v323_v47 = vpop.f32.mrb[19].mxu0 }
  0xfd   :  { %v391_v48 = vpack.c.bf16 %v323_v47, %v320_v44  ;;  %v2048_v44 = vld [vmem:[%s2250_s3] ss:$0 sm:$0xff] }
  0xff   :  { %1311 = vmatprep.subr.bf16.mxu1 %v391_v48 }
 0x100   :  { %1312 = vmatpush3.bf16.msra.mxu1 %v383_v24  ;;  %v1951_v24 = vld [vmem:[%s2248_s0 + $0x94] ss:$8 sps:$4 sm:$0xff]  }
 0x101   :  { %v1583_v49 = vpop.f32.mrb[20].mxu0  ;;  %1313 = vmatprep.subr.bf16.mxu1 %v392_v46 }
 0x102   :  { %v336_v50 = vpop.f32.mrb[21].mxu0 }
 0x103   :  { %v1584_v51 = vpop.f32.mrb[22].mxu0 }
 0x104   :  { %v394_v52 = vpack.c.bf16 %v1584_v51, %v1583_v49  ;;  %v339_v53 = vpop.f32.mrb[23].mxu0  ;;  %1314 = vmatpush3.bf16.msra.mxu1 %v384_v22  ;;  %v1939_v22 = vld [vmem:[%s2248_s0 + $0x84] ss:$8 sps:$4 sm:$0xff]  }
 0x105   :  { %v393_v54 = vpack.c.bf16 %v339_v53, %v336_v50 }
 0x107   :  { %1315 = vmatprep.subr.bf16.mxu1 %v393_v54 }
 0x108   :  { %1316 = vmatpush3.bf16.msra.mxu1 %v385_v30  ;;  %v1982_v30 = vld [vmem:[%s2248_s0 + $0xb0] ss:$8 sps:$4 sm:$0xff]  }
 0x109   :  { %v1587_v55 = vpop.f32.mrb[24].mxu0  ;;  %1317 = vmatprep.subr.bf16.mxu1 %v394_v52 }
 0x10a   :  { %v352_v56 = vpop.f32.mrb[25].mxu0 }
 0x10b   :  { %v1588_v57 = vpop.f32.mrb[26].mxu0 }
 0x10c   :  { %v396_v58 = vpack.c.bf16 %v1588_v57, %v1587_v55  ;;  %v355_v59 = vpop.f32.mrb[27].mxu0  ;;  %1318 = vmatpush3.bf16.msra.mxu1 %v386_v28  ;;  %v1972_v28 = vld [vmem:[%s2248_s0 + $0xb4] ss:$8 sps:$4 sm:$0xff]  }
 0x10d   :  { %v395_v60 = vpack.c.bf16 %v355_v59, %v352_v56 }
 0x10f   :  { %1319 = vmatprep.subr.bf16.mxu1 %v395_v60 }
 0x110   :  { %1320 = vmatpush3.bf16.msra.mxu1 %v387_v36  ;;  %v1728_v36 = vld [vmem:[%s2249_s4 + $0x30] sm:$0xff]  }
 0x111   :  { %v1591_v61 = vpop.f32.mrb[28].mxu0  ;;  %1321 = vmatprep.subr.bf16.mxu1 %v396_v58  ;;  %1605 = vmatprep.subr.bf16.mxu0 %v1728_v36 }
 0x112   :  { %v368_v62 = vpop.f32.mrb[29].mxu0  ;;  %1606 = vmatpush3.bf16.msra.mxu0 %v1728_v36 }
 0x113   :  { %v1592_v63 = vpop.f32.mrb[30].mxu0  ;;  %1607 = vmatprep.subr.bf16.mxu0 %v1729_v37 }
 0x114   :  { %v398_v0 = vpack.c.bf16 %v1592_v63, %v1591_v61  ;;  %v371_v1 = vpop.f32.mrb[31].mxu0  ;;  %1322 = vmatpush3.bf16.msra.mxu1 %v388_v34  ;;  %v2000_v34 = vld [vmem:[%s2248_s0 + $0xc0] ss:$8 sps:$4 sm:$0xff]  }
 0x115   :  { %v397_v2 = vpack.c.bf16 %v371_v1, %v368_v62 }
 0x116   :  { %1608 = vmatpush3.bf16.msra.mxu0 %v1729_v37 }
 0x117   :  { %1323 = vmatprep.subr.bf16.mxu1 %v397_v2 }
 0x118   :  { %1324 = vmatpush3.bf16.msra.mxu1 %v389_v42  ;;  %v2042_v42 = vld [vmem:[%s2248_s0 + $0xf0] ss:$8 sps:$4 sm:$0xff]  }
 0x119   :  { %1325 = vmatprep.subr.bf16.mxu1 %v398_v0 }
 0x11c   :  { %1326 = vmatpush3.bf16.msra.mxu1 %v390_v40  ;;  %v2030_v40 = vld [vmem:[%s2248_s0 + $0xe0] ss:$8 sps:$4 sm:$0xff]  }
 0x11f   :  { %599 = vmatmul.mubr.bf16.vlgmr.msra.gmra.mrb[0].mxu1 %v1844_v4 }
 0x120   :  { %606 = vmatprep.mubr.bf16.mxu1 %v1852_v6 }
 0x127   :  { %607 = vmatmul.mubr.bf16.gmra.mrb[4].mxu1 %v1862_v8 }
 0x128   :  { %614 = vmatprep.mubr.bf16.mxu1 %v1867_v9 }
 0x12f   :  { %615 = vmatmul.mubr.bf16.gmra.mrb[8].mxu1 %v1874_v10 }
 0x130   :  { %622 = vmatprep.mubr.bf16.mxu1 %v1879_v11 }
 0x137   :  { %623 = vmatmul.mubr.bf16.gmra.mrb[12].mxu1 %v1886_v12 }
 0x138   :  { %630 = vmatprep.mubr.bf16.mxu1 %v1891_v13 }
 0x13f   :  { %631 = vmatmul.mubr.bf16.gmra.mrb[16].mxu1 %v1898_v14 }
 0x140   :  { %638 = vmatprep.mubr.bf16.mxu1 %v1903_v15 }
 0x147   :  { %639 = vmatmul.mubr.bf16.gmra.mrb[20].mxu1 %v1910_v16 }
 0x148   :  { %646 = vmatprep.mubr.bf16.mxu1 %v1915_v17 }
 0x14f   :  { %647 = vmatmul.mubr.bf16.gmra.mrb[24].mxu1 %v1922_v19 }
 0x150   :  { %654 = vmatprep.mubr.bf16.mxu1 %v1927_v20 }
 0x157   :  { %655 = vmatmul.mubr.bf16.gmra.mrb[28].mxu1 %v1934_v21 }
 0x158   :  { %662 = vmatprep.mubr.bf16.mxu1 %v1939_v22 }
 0x15f   :  { %663 = vmatmul.mubr.bf16.gmra.mrb[32].mxu1 %v1946_v23 }
 0x160   :  { %670 = vmatprep.mubr.bf16.mxu1 %v1951_v24 }
 0x167   :  { %671 = vmatmul.mubr.bf16.gmra.mrb[36].mxu1 %v1958_v25 }
 0x168   :  { %678 = vmatprep.mubr.bf16.mxu1 %v1704_v26 }
 0x16f   :  { %679 = vmatmul.mubr.bf16.gmra.mrb[40].mxu1 %v1967_v27 }
 0x170   :  { %686 = vmatprep.mubr.bf16.mxu1 %v1972_v28 }
 0x177   :  { %687 = vmatmul.mubr.bf16.gmra.mrb[44].mxu1 %v1982_v30 }
 0x178   :  { %694 = vmatprep.mubr.bf16.mxu1 %v1987_v31 }
 0x17f   :  { %695 = vmatmul.mubr.bf16.gmra.mrb[48].mxu1 %v2000_v34 }
 0x180   :  { %702 = vmatprep.mubr.bf16.mxu1 %v2005_v35 }
 0x187   :  { %703 = vmatmul.mubr.bf16.gmra.mrb[52].mxu1 %v2018_v38 }
 0x188   :  { %710 = vmatprep.mubr.bf16.mxu1 %v2023_v39 }
 0x18f   :  { %711 = vmatmul.mubr.bf16.gmra.mrb[56].mxu1 %v2030_v40 }
 0x190   :  { %718 = vmatprep.mubr.bf16.mxu1 %v2035_v41 }
 0x197   :  { %719 = vmatmul.mubr.bf16.gmra.mrb[60].mxu1 %v2042_v42 }
 0x198   :  { %1135 = vmatprep.mubr.bf16.mxu1 %v1704_v26 }
 0x1f2   :  { %v1327_v43 = vpop.f32.mrb[0].mxu1 }
 0x1f3   :  { %v1328_v45 = vpop.f32.mrb[1].mxu1 }
 0x1f4   :  { %v1329_v46 = vadd.f32 %v1328_v45, %v1327_v43  ;;  %v1330_v47 = vpop.f32.mrb[2].mxu1 }
 0x1f5   :  { %v1331_v48 = vpop.f32.mrb[3].mxu1 }
 0x1f6   :  { %v601_v49 = vadd.f32 %v1329_v46, %v2048_v44  ;;  %v1332_v50 = vadd.f32 %v1331_v48, %v1330_v47 }
 0x1f8   :  { %v604_v51 = vadd.f32 %v1332_v50, %v2048_v44  ;;  %v727_v52 = vmax.f32 %v601_v49, 0.0 }
 0x1fa   :  { %v728_v53 = vmax.f32 %v604_v51, 0.0  ;;  %v1333_v54 = vpop.f32.mrb[4].mxu1 }
 0x1fb   :  { %v1334_v55 = vpop.f32.mrb[5].mxu1 }
 0x1fc   :  { %v1335_v56 = vadd.f32 %v1334_v55, %v1333_v54  ;;  %v1336_v57 = vpop.f32.mrb[6].mxu1  ;;  %v759_v58 = vpack.c.bf16 %v728_v53, %v727_v52 }
 0x1fd   :  { %v1337_v59 = vpop.f32.mrb[7].mxu1 }
 0x1fe   :  { %v609_v60 = vadd.f32 %v1335_v56, %v2048_v44  ;;  %v1338_v61 = vadd.f32 %v1337_v59, %v1336_v57  ;;  %1609 = vmatprep.mubr.bf16.mxu0 %v759_v58 }
 0x200   :  { %v612_v62 = vadd.f32 %v1338_v61, %v2048_v44  ;;  %v729_v63 = vmax.f32 %v609_v60, 0.0 }
 0x202   :  { %v730_v0 = vmax.f32 %v612_v62, 0.0  ;;  %v1339_v1 = vpop.f32.mrb[8].mxu1 }
 0x203   :  { %v1340_v2 = vpop.f32.mrb[9].mxu1 }
 0x204   :  { %v760_v3 = vpack.c.bf16 %v730_v0, %v729_v63  ;;  %v1341_v5 = vadd.f32 %v1340_v2, %v1339_v1  ;;  %v1342_v7 = vpop.f32.mrb[10].mxu1 }
 0x205   :  { %v1343_v26 = vpop.f32.mrb[11].mxu1 }
 0x206   :  { %v617_v29 = vadd.f32 %v1341_v5, %v2048_v44  ;;  %v1344_v32 = vadd.f32 %v1343_v26, %v1342_v7  ;;  %1610 = vmatmul.mubr.bf16.vlgmr.msra.gmra.mrb[32].mxu0 %v760_v3 }
 0x208   :  { %v620_v33 = vadd.f32 %v1344_v32, %v2048_v44  ;;  %v731_v36 = vmax.f32 %v617_v29, 0.0 }
 0x20a   :  { %v732_v37 = vmax.f32 %v620_v33, 0.0  ;;  %v1345_v43 = vpop.f32.mrb[12].mxu1 }
 0x20b   :  { %v1346_v45 = vpop.f32.mrb[13].mxu1 }
 0x20c   :  { %v1347_v46 = vadd.f32 %v1346_v45, %v1345_v43  ;;  %v1348_v47 = vpop.f32.mrb[14].mxu1  ;;  %v761_v48 = vpack.c.bf16 %v732_v37, %v731_v36 }
 0x20d   :  { %v1349_v49 = vpop.f32.mrb[15].mxu1 }
 0x20e   :  { %v625_v50 = vadd.f32 %v1347_v46, %v2048_v44  ;;  %v1350_v51 = vadd.f32 %v1349_v49, %v1348_v47  ;;  %1613 = vmatprep.mubr.bf16.mxu0 %v761_v48 }
 0x210   :  { %v628_v52 = vadd.f32 %v1350_v51, %v2048_v44  ;;  %v733_v53 = vmax.f32 %v625_v50, 0.0 }
 0x212   :  { %v734_v54 = vmax.f32 %v628_v52, 0.0  ;;  %v1351_v55 = vpop.f32.mrb[16].mxu1 }
 0x213   :  { %v1352_v56 = vpop.f32.mrb[17].mxu1 }
 0x214   :  { %v1353_v57 = vadd.f32 %v1352_v56, %v1351_v55  ;;  %v1354_v58 = vpop.f32.mrb[18].mxu1  ;;  %v762_v59 = vpack.c.bf16 %v734_v54, %v733_v53 }
 0x215   :  { %v1355_v60 = vpop.f32.mrb[19].mxu1 }
 0x216   :  { %v633_v61 = vadd.f32 %v1353_v57, %v2048_v44  ;;  %v1356_v62 = vadd.f32 %v1355_v60, %v1354_v58  ;;  %1614 = vmatmul.mubr.bf16.gmra.mrb[36].mxu0 %v762_v59 }
 0x218   :  { %v636_v63 = vadd.f32 %v1356_v62, %v2048_v44  ;;  %v735_v0 = vmax.f32 %v633_v61, 0.0 }
 0x21a   :  { %v736_v1 = vmax.f32 %v636_v63, 0.0  ;;  %v1357_v2 = vpop.f32.mrb[20].mxu1 }
 0x21b   :  { %v1358_v3 = vpop.f32.mrb[21].mxu1 }
 0x21c   :  { %v1359_v5 = vadd.f32 %v1358_v3, %v1357_v2  ;;  %v1360_v7 = vpop.f32.mrb[22].mxu1  ;;  %v763_v26 = vpack.c.bf16 %v736_v1, %v735_v0 }
 0x21d   :  { %v1361_v29 = vpop.f32.mrb[23].mxu1 }
 0x21e   :  { %v641_v32 = vadd.f32 %v1359_v5, %v2048_v44  ;;  %v1362_v33 = vadd.f32 %v1361_v29, %v1360_v7  ;;  %1617 = vmatprep.mubr.bf16.mxu0 %v763_v26 }
 0x220   :  { %v644_v36 = vadd.f32 %v1362_v33, %v2048_v44  ;;  %v737_v37 = vmax.f32 %v641_v32, 0.0 }
 0x222   :  { %v738_v43 = vmax.f32 %v644_v36, 0.0  ;;  %v1363_v45 = vpop.f32.mrb[24].mxu1 }
 0x223   :  { %v1364_v46 = vpop.f32.mrb[25].mxu1 }
 0x224   :  { %v1365_v47 = vadd.f32 %v1364_v46, %v1363_v45  ;;  %v1366_v48 = vpop.f32.mrb[26].mxu1  ;;  %v764_v49 = vpack.c.bf16 %v738_v43, %v737_v37 }
 0x225   :  { %v1367_v50 = vpop.f32.mrb[27].mxu1 }
 0x226   :  { %v649_v51 = vadd.f32 %v1365_v47, %v2048_v44  ;;  %v1368_v52 = vadd.f32 %v1367_v50, %v1366_v48  ;;  %1618 = vmatmul.mubr.bf16.gmra.mrb[40].mxu0 %v764_v49 }
 0x228   :  { %v652_v53 = vadd.f32 %v1368_v52, %v2048_v44  ;;  %v739_v54 = vmax.f32 %v649_v51, 0.0 }
 0x22a   :  { %v740_v55 = vmax.f32 %v652_v53, 0.0  ;;  %v1369_v56 = vpop.f32.mrb[28].mxu1 }
 0x22b   :  { %v1370_v57 = vpop.f32.mrb[29].mxu1 }
 0x22c   :  { %v1371_v58 = vadd.f32 %v1370_v57, %v1369_v56  ;;  %v1372_v59 = vpop.f32.mrb[30].mxu1  ;;  %v765_v60 = vpack.c.bf16 %v740_v55, %v739_v54 }
 0x22d   :  { %v1373_v61 = vpop.f32.mrb[31].mxu1 }
 0x22e   :  { %v657_v62 = vadd.f32 %v1371_v58, %v2048_v44  ;;  %v1374_v63 = vadd.f32 %v1373_v61, %v1372_v59  ;;  %1621 = vmatprep.mubr.bf16.mxu0 %v765_v60 }
 0x230   :  { %v660_v0 = vadd.f32 %v1374_v63, %v2048_v44  ;;  %v741_v1 = vmax.f32 %v657_v62, 0.0 }
 0x232   :  { %v742_v2 = vmax.f32 %v660_v0, 0.0  ;;  %v1375_v3 = vpop.f32.mrb[32].mxu1 }
 0x233   :  { %v1376_v5 = vpop.f32.mrb[33].mxu1 }
 0x234   :  { %v1377_v7 = vadd.f32 %v1376_v5, %v1375_v3  ;;  %v1378_v26 = vpop.f32.mrb[34].mxu1  ;;  %v766_v29 = vpack.c.bf16 %v742_v2, %v741_v1 }
 0x235   :  { %v1379_v32 = vpop.f32.mrb[35].mxu1 }
 0x236   :  { %v665_v33 = vadd.f32 %v1377_v7, %v2048_v44  ;;  %v1380_v36 = vadd.f32 %v1379_v32, %v1378_v26  ;;  %1622 = vmatmul.mubr.bf16.gmra.mrb[44].mxu0 %v766_v29 }
 0x238   :  { %v668_v37 = vadd.f32 %v1380_v36, %v2048_v44  ;;  %v743_v43 = vmax.f32 %v665_v33, 0.0 }
 0x23a   :  { %v744_v45 = vmax.f32 %v668_v37, 0.0  ;;  %v1381_v46 = vpop.f32.mrb[36].mxu1 }
 0x23b   :  { %v1382_v47 = vpop.f32.mrb[37].mxu1 }
 0x23c   :  { %v1383_v48 = vadd.f32 %v1382_v47, %v1381_v46  ;;  %v1384_v49 = vpop.f32.mrb[38].mxu1  ;;  %v767_v50 = vpack.c.bf16 %v744_v45, %v743_v43 }
 0x23d   :  { %v1385_v51 = vpop.f32.mrb[39].mxu1 }
 0x23e   :  { %v673_v52 = vadd.f32 %v1383_v48, %v2048_v44  ;;  %v1386_v53 = vadd.f32 %v1385_v51, %v1384_v49  ;;  %1625 = vmatprep.mubr.bf16.mxu0 %v767_v50 }
 0x240   :  { %v676_v54 = vadd.f32 %v1386_v53, %v2048_v44  ;;  %v745_v55 = vmax.f32 %v673_v52, 0.0 }
 0x242   :  { %v746_v56 = vmax.f32 %v676_v54, 0.0  ;;  %v1387_v57 = vpop.f32.mrb[40].mxu1 }
 0x243   :  { %v1388_v58 = vpop.f32.mrb[41].mxu1 }
 0x244   :  { %v768_v59 = vpack.c.bf16 %v746_v56, %v745_v55  ;;  %v1389_v60 = vadd.f32 %v1388_v58, %v1387_v57  ;;  %v1390_v61 = vpop.f32.mrb[42].mxu1 }
 0x245   :  { %v1391_v62 = vpop.f32.mrb[43].mxu1 }
 0x246   :  { %1626 = vmatmul.mubr.bf16.gmra.mrb[48].mxu0 %v768_v59  ;;  %v681_v63 = vadd.f32 %v1389_v60, %v2048_v44  ;;  %v1392_v0 = vadd.f32 %v1391_v62, %v1390_v61 }
 0x248   :  { %v684_v1 = vadd.f32 %v1392_v0, %v2048_v44  ;;  %v747_v2 = vmax.f32 %v681_v63, 0.0 }
 0x24a   :  { %v748_v3 = vmax.f32 %v684_v1, 0.0  ;;  %v1393_v5 = vpop.f32.mrb[44].mxu1 }
 0x24b   :  { %v1394_v7 = vpop.f32.mrb[45].mxu1 }
 0x24c   :  { %v1395_v26 = vadd.f32 %v1394_v7, %v1393_v5  ;;  %v1396_v29 = vpop.f32.mrb[46].mxu1  ;;  %v769_v32 = vpack.c.bf16 %v748_v3, %v747_v2 }
 0x24d   :  { %v1397_v33 = vpop.f32.mrb[47].mxu1 }
 0x24e   :  { %v689_v36 = vadd.f32 %v1395_v26, %v2048_v44  ;;  %v1398_v37 = vadd.f32 %v1397_v33, %v1396_v29  ;;  %1629 = vmatprep.mubr.bf16.mxu0 %v769_v32 }
 0x250   :  { %v692_v43 = vadd.f32 %v1398_v37, %v2048_v44  ;;  %v749_v45 = vmax.f32 %v689_v36, 0.0 }
 0x252   :  { %v750_v46 = vmax.f32 %v692_v43, 0.0  ;;  %v1399_v47 = vpop.f32.mrb[48].mxu1 }
 0x253   :  { %v1400_v48 = vpop.f32.mrb[49].mxu1 }
 0x254   :  { %v770_v49 = vpack.c.bf16 %v750_v46, %v749_v45  ;;  %v1401_v50 = vadd.f32 %v1400_v48, %v1399_v47  ;;  %v1402_v51 = vpop.f32.mrb[50].mxu1 }
 0x255   :  { %v1403_v52 = vpop.f32.mrb[51].mxu1 }
 0x256   :  { %1630 = vmatmul.mubr.bf16.gmra.mrb[52].mxu0 %v770_v49  ;;  %v697_v53 = vadd.f32 %v1401_v50, %v2048_v44  ;;  %v1404_v54 = vadd.f32 %v1403_v52, %v1402_v51 }
 0x258   :  { %v700_v55 = vadd.f32 %v1404_v54, %v2048_v44  ;;  %v751_v56 = vmax.f32 %v697_v53, 0.0 }
 0x25a   :  { %v752_v57 = vmax.f32 %v700_v55, 0.0  ;;  %v1405_v58 = vpop.f32.mrb[52].mxu1 }
 0x25b   :  { %v1406_v59 = vpop.f32.mrb[53].mxu1 }
 0x25c   :  { %v1407_v60 = vadd.f32 %v1406_v59, %v1405_v58  ;;  %v1408_v61 = vpop.f32.mrb[54].mxu1  ;;  %v771_v62 = vpack.c.bf16 %v752_v57, %v751_v56 }
 0x25d   :  { %v1409_v63 = vpop.f32.mrb[55].mxu1 }
 0x25e   :  { %v705_v0 = vadd.f32 %v1407_v60, %v2048_v44  ;;  %v1410_v1 = vadd.f32 %v1409_v63, %v1408_v61  ;;  %1633 = vmatprep.mubr.bf16.mxu0 %v771_v62 }
 0x260   :  { %v708_v2 = vadd.f32 %v1410_v1, %v2048_v44  ;;  %v753_v3 = vmax.f32 %v705_v0, 0.0 }
 0x262   :  { %v754_v5 = vmax.f32 %v708_v2, 0.0  ;;  %v1411_v7 = vpop.f32.mrb[56].mxu1 }
 0x263   :  { %v1412_v26 = vpop.f32.mrb[57].mxu1 }
 0x264   :  { %v772_v29 = vpack.c.bf16 %v754_v5, %v753_v3  ;;  %v1413_v32 = vadd.f32 %v1412_v26, %v1411_v7  ;;  %v1414_v33 = vpop.f32.mrb[58].mxu1 }
 0x265   :  { %v1415_v36 = vpop.f32.mrb[59].mxu1 }
 0x266   :  { %1634 = vmatmul.mubr.bf16.gmra.mrb[56].mxu0 %v772_v29  ;;  %v713_v37 = vadd.f32 %v1413_v32, %v2048_v44  ;;  %v1416_v43 = vadd.f32 %v1415_v36, %v1414_v33 }
 0x268   :  { %v716_v45 = vadd.f32 %v1416_v43, %v2048_v44  ;;  %v755_v46 = vmax.f32 %v713_v37, 0.0 }
 0x26a   :  { %v756_v47 = vmax.f32 %v716_v45, 0.0  ;;  %v1417_v48 = vpop.f32.mrb[60].mxu1 }
 0x26b   :  { %v1418_v49 = vpop.f32.mrb[61].mxu1 }
 0x26c   :  { %v1419_v50 = vadd.f32 %v1418_v49, %v1417_v48  ;;  %v1420_v51 = vpop.f32.mrb[62].mxu1  ;;  %v773_v52 = vpack.c.bf16 %v756_v47, %v755_v46 }
 0x26d   :  { %v1421_v53 = vpop.f32.mrb[63].mxu1 }
 0x26e   :  { %v721_v54 = vadd.f32 %v1419_v50, %v2048_v44  ;;  %v1422_v55 = vadd.f32 %v1421_v53, %v1420_v51  ;;  %1637 = vmatprep.mubr.bf16.mxu0 %v773_v52 }
 0x270   :  { %v724_v56 = vadd.f32 %v1422_v55, %v2048_v44  ;;  %v757_v57 = vmax.f32 %v721_v54, 0.0 }
 0x272   :  { %v758_v58 = vmax.f32 %v724_v56, 0.0 }
 0x274   :  { %v774_v59 = vpack.c.bf16 %v758_v58, %v757_v57 }
 0x276   :  { %1638 = vmatmul.mubr.bf16.gmra.mrb[60].mxu0 %v774_v59 }
 0x277   :  { %1055 = vmatprep.mubr.bf16.mxu0 %v1835_v18 }
 0x2d9   :  { %v1611_v60 = vpop.f32.mrb[32].mxu0 }
 0x2da   :  { %v873_v61 = vpop.f32.mrb[33].mxu0 }
 0x2db   :  { %v1612_v62 = vpop.f32.mrb[34].mxu0 }
 0x2dc   :  { %v1001_v63 = vpack.c.bf16 %v1612_v62, %v1611_v60  ;;  %v876_v0 = vpop.f32.mrb[35].mxu0 }
 0x2dd   :  { %v1000_v1 = vpack.c.bf16 %v876_v0, %v873_v61 }
 0x2e9   :  { %v1615_v2 = vpop.f32.mrb[36].mxu0 }
 0x2ea   :  { %v889_v3 = vpop.f32.mrb[37].mxu0 }
 0x2eb   :  { %v1616_v5 = vpop.f32.mrb[38].mxu0 }
 0x2ec   :  { %v1003_v7 = vpack.c.bf16 %v1616_v5, %v1615_v2  ;;  %v892_v26 = vpop.f32.mrb[39].mxu0 }
 0x2ed   :  { %v1002_v29 = vpack.c.bf16 %v892_v26, %v889_v3 }
 0x2f9   :  { %v1619_v32 = vpop.f32.mrb[40].mxu0 }
 0x2fa   :  { %v905_v44 = vpop.f32.mrb[41].mxu0 }
 0x2fb   :  { %v1620_v33 = vpop.f32.mrb[42].mxu0 }
 0x2fc   :  { %v1005_v36 = vpack.c.bf16 %v1620_v33, %v1619_v32  ;;  %v908_v37 = vpop.f32.mrb[43].mxu0 }
 0x2fd   :  { %v1004_v43 = vpack.c.bf16 %v908_v37, %v905_v44 }
 0x309   :  { %v1623_v45 = vpop.f32.mrb[44].mxu0 }
 0x30a   :  { %v921_v18 = vpop.f32.mrb[45].mxu0 }
 0x30b   :  { %v1624_v46 = vpop.f32.mrb[46].mxu0 }
 0x30c   :  { %v1007_v47 = vpack.c.bf16 %v1624_v46, %v1623_v45  ;;  %v924_v48 = vpop.f32.mrb[47].mxu0 }
 0x30d   :  { %v1006_v49 = vpack.c.bf16 %v924_v48, %v921_v18 }
 0x319   :  { %v1627_v50 = vpop.f32.mrb[48].mxu0 }
 0x31a   :  { %v937_v51 = vpop.f32.mrb[49].mxu0 }
 0x31b   :  { %v1628_v52 = vpop.f32.mrb[50].mxu0 }
 0x31c   :  { %v1009_v53 = vpack.c.bf16 %v1628_v52, %v1627_v50  ;;  %v940_v54 = vpop.f32.mrb[51].mxu0 }
 0x31d   :  { %v1008_v55 = vpack.c.bf16 %v940_v54, %v937_v51 }
 0x31f   :  { %1447 = vmatprep.subr.bf16.mxu0 %v1008_v55  ;;  %1641 = vmatprep.subr.bf16.mxu1 %v1008_v55 }
 0x320   :  { %1448 = vmatpush3.bf16.msra.mxu0 %v1000_v1  ;;  %1649 = vmatpush3.bf16.msra.mxu1 %v1000_v1 }
 0x321   :  { %1449 = vmatprep.subr.bf16.mxu0 %v1009_v53  ;;  %1642 = vmatprep.subr.bf16.mxu1 %v1009_v53 }
 0x324   :  { %1450 = vmatpush3.bf16.msra.mxu0 %v1001_v63  ;;  %1650 = vmatpush3.bf16.msra.mxu1 %v1001_v63 }
 0x329   :  { %v1631_v56 = vpop.f32.mrb[52].mxu0 }
 0x32a   :  { %v953_v57 = vpop.f32.mrb[53].mxu0 }
 0x32b   :  { %v1632_v58 = vpop.f32.mrb[54].mxu0 }
 0x32c   :  { %v1011_v59 = vpack.c.bf16 %v1632_v58, %v1631_v56  ;;  %v956_v60 = vpop.f32.mrb[55].mxu0 }
 0x32d   :  { %v1010_v61 = vpack.c.bf16 %v956_v60, %v953_v57 }
 0x32f   :  { %1451 = vmatprep.subr.bf16.mxu0 %v1010_v61  ;;  %1643 = vmatprep.subr.bf16.mxu1 %v1010_v61 }
 0x330   :  { %1452 = vmatpush3.bf16.msra.mxu0 %v1002_v29  ;;  %1651 = vmatpush3.bf16.msra.mxu1 %v1002_v29 }
 0x331   :  { %1453 = vmatprep.subr.bf16.mxu0 %v1011_v59  ;;  %1644 = vmatprep.subr.bf16.mxu1 %v1011_v59 }
 0x334   :  { %1454 = vmatpush3.bf16.msra.mxu0 %v1003_v7  ;;  %1652 = vmatpush3.bf16.msra.mxu1 %v1003_v7 }
 0x339   :  { %v1635_v62 = vpop.f32.mrb[56].mxu0 }
 0x33a   :  { %v969_v0 = vpop.f32.mrb[57].mxu0 }
 0x33b   :  { %v1636_v1 = vpop.f32.mrb[58].mxu0 }
 0x33c   :  { %v1013_v2 = vpack.c.bf16 %v1636_v1, %v1635_v62  ;;  %v972_v3 = vpop.f32.mrb[59].mxu0 }
 0x33d   :  { %v1012_v63 = vpack.c.bf16 %v972_v3, %v969_v0 }
 0x33f   :  { %1455 = vmatprep.subr.bf16.mxu0 %v1012_v63  ;;  %1645 = vmatprep.subr.bf16.mxu1 %v1012_v63 }
 0x340   :  { %1456 = vmatpush3.bf16.msra.mxu0 %v1004_v43  ;;  %1653 = vmatpush3.bf16.msra.mxu1 %v1004_v43 }
 0x341   :  { %1457 = vmatprep.subr.bf16.mxu0 %v1013_v2  ;;  %1646 = vmatprep.subr.bf16.mxu1 %v1013_v2 }
 0x344   :  { %1458 = vmatpush3.bf16.msra.mxu0 %v1005_v36  ;;  %1654 = vmatpush3.bf16.msra.mxu1 %v1005_v36 }
 0x349   :  { %v1639_v5 = vpop.f32.mrb[60].mxu0 }
 0x34a   :  { %v985_v26 = vpop.f32.mrb[61].mxu0 }
 0x34b   :  { %v1640_v29 = vpop.f32.mrb[62].mxu0 }
 0x34c   :  { %v1015_v32 = vpack.c.bf16 %v1640_v29, %v1639_v5  ;;  %v988_v44 = vpop.f32.mrb[63].mxu0 }
 0x34d   :  { %v1014_v7 = vpack.c.bf16 %v988_v44, %v985_v26 }
 0x34f   :  { %1459 = vmatprep.subr.bf16.mxu0 %v1014_v7  ;;  %1647 = vmatprep.subr.bf16.mxu1 %v1014_v7 }
 0x350   :  { %1460 = vmatpush3.bf16.msra.mxu0 %v1006_v49  ;;  %1655 = vmatpush3.bf16.msra.mxu1 %v1006_v49 }
 0x351   :  { %1461 = vmatprep.subr.bf16.mxu0 %v1015_v32  ;;  %1648 = vmatprep.subr.bf16.mxu1 %v1015_v32 }
 0x354   :  { %1462 = vmatpush3.bf16.msra.mxu0 %v1007_v47  ;;  %1656 = vmatpush3.bf16.msra.mxu1 %v1007_v47 }
 0x357   :  { %1056 = vmatmul.mubr.bf16.vlgmr.msra.gmra.mrb[64].mxu0 %v1844_v4  ;;  %1136 = vmatmul.mubr.bf16.vlgmr.msra.gmra.mrb[64].mxu1 %v1967_v27 }
 0x358   :  { %1063 = vmatprep.mubr.bf16.mxu0 %v1852_v6  ;;  %1143 = vmatprep.mubr.bf16.mxu1 %v1972_v28 }
 0x35f   :  { %1064 = vmatmul.mubr.bf16.gmra.mrb[68].mxu0 %v1862_v8  ;;  %1144 = vmatmul.mubr.bf16.gmra.mrb[68].mxu1 %v1982_v30  ;;  %v2116_v8 = vld [vmem:[%s2251_s5] ss:$0 sm:$0xff] }
 0x360   :  { %1071 = vmatprep.mubr.bf16.mxu0 %v1867_v9  ;;  %1151 = vmatprep.mubr.bf16.mxu1 %v1987_v31 }
 0x367   :  { %1072 = vmatmul.mubr.bf16.gmra.mrb[72].mxu0 %v1874_v10  ;;  %1152 = vmatmul.mubr.bf16.gmra.mrb[72].mxu1 %v2000_v34 }
 0x368   :  { %1079 = vmatprep.mubr.bf16.mxu0 %v1879_v11  ;;  %1159 = vmatprep.mubr.bf16.mxu1 %v2005_v35 }
 0x36f   :  { %1080 = vmatmul.mubr.bf16.gmra.mrb[76].mxu0 %v1886_v12  ;;  %1160 = vmatmul.mubr.bf16.gmra.mrb[76].mxu1 %v2018_v38 }
 0x370   :  { %1087 = vmatprep.mubr.bf16.mxu0 %v1891_v13  ;;  %1167 = vmatprep.mubr.bf16.mxu1 %v2023_v39 }
 0x377   :  { %1088 = vmatmul.mubr.bf16.gmra.mrb[80].mxu0 %v1898_v14  ;;  %1168 = vmatmul.mubr.bf16.gmra.mrb[80].mxu1 %v2030_v40 }
 0x378   :  { %1095 = vmatprep.mubr.bf16.mxu0 %v1903_v15  ;;  %1175 = vmatprep.mubr.bf16.mxu1 %v2035_v41 }
 0x37f   :  { %1096 = vmatmul.mubr.bf16.gmra.mrb[84].mxu0 %v1910_v16  ;;  %1176 = vmatmul.mubr.bf16.gmra.mrb[84].mxu1 %v2042_v42 }
 0x380   :  { %1103 = vmatprep.mubr.bf16.mxu0 %v1915_v17 }
 0x387   :  { %1104 = vmatmul.mubr.bf16.gmra.mrb[88].mxu0 %v1922_v19 }
 0x388   :  { %1111 = vmatprep.mubr.bf16.mxu0 %v1927_v20 }
 0x38f   :  { %1112 = vmatmul.mubr.bf16.gmra.mrb[92].mxu0 %v1934_v21 }
 0x390   :  { %1119 = vmatprep.mubr.bf16.mxu0 %v1939_v22 }
 0x397   :  { %1120 = vmatmul.mubr.bf16.gmra.mrb[96].mxu0 %v1946_v23 }
 0x398   :  { %1127 = vmatprep.mubr.bf16.mxu0 %v1951_v24 }
 0x39f   :  { %1128 = vmatmul.mubr.bf16.gmra.mrb[100].mxu0 %v1958_v25 }
 0x42a   :  { %v1463_v4 = vpop.f32.mrb[64].mxu0  ;;  %v1523_v6 = vpop.f32.mrb[64].mxu1 }
 0x42b   :  { %v1464_v9 = vpop.f32.mrb[65].mxu0  ;;  %v1524_v10 = vpop.f32.mrb[65].mxu1 }
 0x42c   :  { %v1465_v11 = vadd.f32 %v1464_v9, %v1463_v4  ;;  %v1466_v12 = vpop.f32.mrb[66].mxu0  ;;  %v1525_v13 = vadd.f32 %v1524_v10, %v1523_v6  ;;  %v1526_v14 = vpop.f32.mrb[66].mxu1 }
 0x42d   :  { %v1467_v15 = vpop.f32.mrb[67].mxu0  ;;  %v1527_v16 = vpop.f32.mrb[67].mxu1 }
 0x42e   :  { %v1058_v17 = vadd.f32 %v1465_v11, %v2116_v8  ;;  %v1468_v19 = vadd.f32 %v1467_v15, %v1466_v12  ;;  %v1138_v20 = vadd.f32 %v1525_v13, %v2116_v8  ;;  %v1528_v21 = vadd.f32 %v1527_v16, %v1526_v14 }
 0x430   :  { %1184 = vst [vmem:[%s2252_s6] sm:$0xff] %v1058_v17  ;;  %v1061_v22 = vadd.f32 %v1468_v19, %v2116_v8  ;;  %1204 = vst [vmem:[%s2252_s6 + $0xa0] sm:$0xff] %v1138_v20  ;;  %v1141_v23 = vadd.f32 %v1528_v21, %v2116_v8 }
 0x432   :  { %1185 = vst [vmem:[%s2252_s6 + $0x8] sm:$0xff] %v1061_v22  ;;  %v1469_v24 = vpop.f32.mrb[68].mxu0  ;;  %1205 = vst [vmem:[%s2252_s6 + $0xa8] sm:$0xff] %v1141_v23  ;;  %v1529_v25 = vpop.f32.mrb[68].mxu1 }
 0x433   :  { %v1470_v27 = vpop.f32.mrb[69].mxu0  ;;  %v1530_v28 = vpop.f32.mrb[69].mxu1 }
 0x434   :  { %v1471_v30 = vadd.f32 %v1470_v27, %v1469_v24  ;;  %v1472_v31 = vpop.f32.mrb[70].mxu0  ;;  %v1531_v34 = vadd.f32 %v1530_v28, %v1529_v25  ;;  %v1532_v35 = vpop.f32.mrb[70].mxu1 }
 0x435   :  { %v1473_v38 = vpop.f32.mrb[71].mxu0  ;;  %v1533_v39 = vpop.f32.mrb[71].mxu1 }
 0x436   :  { %v1066_v40 = vadd.f32 %v1471_v30, %v2116_v8  ;;  %v1474_v41 = vadd.f32 %v1473_v38, %v1472_v31  ;;  %v1146_v42 = vadd.f32 %v1531_v34, %v2116_v8  ;;  %v1534_v33 = vadd.f32 %v1533_v39, %v1532_v35 }
 0x438   :  { %1186 = vst [vmem:[%s2252_s6 + $0x10] sm:$0xff] %v1066_v40  ;;  %v1069_v36 = vadd.f32 %v1474_v41, %v2116_v8  ;;  %1206 = vst [vmem:[%s2252_s6 + $0xb0] sm:$0xff] %v1146_v42  ;;  %v1149_v37 = vadd.f32 %v1534_v33, %v2116_v8 }
 0x43a   :  { %1187 = vst [vmem:[%s2252_s6 + $0x18] sm:$0xff] %v1069_v36  ;;  %v1475_v43 = vpop.f32.mrb[72].mxu0  ;;  %1207 = vst [vmem:[%s2252_s6 + $0xb8] sm:$0xff] %v1149_v37  ;;  %v1535_v45 = vpop.f32.mrb[72].mxu1 }
 0x43b   :  { %v1476_v18 = vpop.f32.mrb[73].mxu0  ;;  %v1536_v46 = vpop.f32.mrb[73].mxu1 }
 0x43c   :  { %v1477_v47 = vadd.f32 %v1476_v18, %v1475_v43  ;;  %v1478_v48 = vpop.f32.mrb[74].mxu0  ;;  %v1537_v49 = vadd.f32 %v1536_v46, %v1535_v45  ;;  %v1538_v50 = vpop.f32.mrb[74].mxu1 }
 0x43d   :  { %v1479_v51 = vpop.f32.mrb[75].mxu0  ;;  %v1539_v52 = vpop.f32.mrb[75].mxu1 }
 0x43e   :  { %v1074_v53 = vadd.f32 %v1477_v47, %v2116_v8  ;;  %v1480_v54 = vadd.f32 %v1479_v51, %v1478_v48  ;;  %v1154_v55 = vadd.f32 %v1537_v49, %v2116_v8  ;;  %v1540_v56 = vadd.f32 %v1539_v52, %v1538_v50 }
 0x440   :  { %1188 = vst [vmem:[%s2252_s6 + $0x20] sm:$0xff] %v1074_v53  ;;  %v1077_v57 = vadd.f32 %v1480_v54, %v2116_v8  ;;  %1208 = vst [vmem:[%s2252_s6 + $0xc0] sm:$0xff] %v1154_v55  ;;  %v1157_v58 = vadd.f32 %v1540_v56, %v2116_v8 }
 0x442   :  { %1189 = vst [vmem:[%s2252_s6 + $0x28] sm:$0xff] %v1077_v57  ;;  %v1481_v59 = vpop.f32.mrb[76].mxu0  ;;  %1209 = vst [vmem:[%s2252_s6 + $0xc8] sm:$0xff] %v1157_v58  ;;  %v1541_v60 = vpop.f32.mrb[76].mxu1 }
 0x443   :  { %v1482_v61 = vpop.f32.mrb[77].mxu0  ;;  %v1542_v62 = vpop.f32.mrb[77].mxu1 }
 0x444   :  { %v1483_v0 = vadd.f32 %v1482_v61, %v1481_v59  ;;  %v1484_v1 = vpop.f32.mrb[78].mxu0  ;;  %v1543_v2 = vadd.f32 %v1542_v62, %v1541_v60  ;;  %v1544_v3 = vpop.f32.mrb[78].mxu1 }
 0x445   :  { %v1485_v63 = vpop.f32.mrb[79].mxu0  ;;  %v1545_v5 = vpop.f32.mrb[79].mxu1 }
 0x446   :  { %v1082_v26 = vadd.f32 %v1483_v0, %v2116_v8  ;;  %v1486_v29 = vadd.f32 %v1485_v63, %v1484_v1  ;;  %v1162_v32 = vadd.f32 %v1543_v2, %v2116_v8  ;;  %v1546_v44 = vadd.f32 %v1545_v5, %v1544_v3 }
 0x448   :  { %1190 = vst [vmem:[%s2252_s6 + $0x30] sm:$0xff] %v1082_v26  ;;  %v1085_v7 = vadd.f32 %v1486_v29, %v2116_v8  ;;  %1210 = vst [vmem:[%s2252_s6 + $0xd0] sm:$0xff] %v1162_v32  ;;  %v1165_v4 = vadd.f32 %v1546_v44, %v2116_v8 }
 0x44a   :  { %1191 = vst [vmem:[%s2252_s6 + $0x38] sm:$0xff] %v1085_v7  ;;  %v1487_v6 = vpop.f32.mrb[80].mxu0  ;;  %1211 = vst [vmem:[%s2252_s6 + $0xd8] sm:$0xff] %v1165_v4  ;;  %v1547_v9 = vpop.f32.mrb[80].mxu1 }
 0x44b   :  { %v1488_v10 = vpop.f32.mrb[81].mxu0  ;;  %v1548_v11 = vpop.f32.mrb[81].mxu1 }
 0x44c   :  { %v1489_v12 = vadd.f32 %v1488_v10, %v1487_v6  ;;  %v1490_v13 = vpop.f32.mrb[82].mxu0  ;;  %v1549_v14 = vadd.f32 %v1548_v11, %v1547_v9  ;;  %v1550_v15 = vpop.f32.mrb[82].mxu1 }
 0x44d   :  { %v1491_v16 = vpop.f32.mrb[83].mxu0  ;;  %v1551_v17 = vpop.f32.mrb[83].mxu1 }
 0x44e   :  { %v1090_v19 = vadd.f32 %v1489_v12, %v2116_v8  ;;  %v1492_v20 = vadd.f32 %v1491_v16, %v1490_v13  ;;  %v1170_v21 = vadd.f32 %v1549_v14, %v2116_v8  ;;  %v1552_v22 = vadd.f32 %v1551_v17, %v1550_v15 }
 0x450   :  { %1192 = vst [vmem:[%s2252_s6 + $0x40] sm:$0xff] %v1090_v19  ;;  %v1093_v23 = vadd.f32 %v1492_v20, %v2116_v8  ;;  %1212 = vst [vmem:[%s2252_s6 + $0xe0] sm:$0xff] %v1170_v21  ;;  %v1173_v24 = vadd.f32 %v1552_v22, %v2116_v8 }
 0x452   :  { %1193 = vst [vmem:[%s2252_s6 + $0x48] sm:$0xff] %v1093_v23  ;;  %v1493_v25 = vpop.f32.mrb[84].mxu0  ;;  %1213 = vst [vmem:[%s2252_s6 + $0xe8] sm:$0xff] %v1173_v24  ;;  %v1553_v27 = vpop.f32.mrb[84].mxu1 }
 0x453   :  { %v1494_v28 = vpop.f32.mrb[85].mxu0  ;;  %v1554_v30 = vpop.f32.mrb[85].mxu1 }
 0x454   :  { %v1495_v31 = vadd.f32 %v1494_v28, %v1493_v25  ;;  %v1496_v34 = vpop.f32.mrb[86].mxu0  ;;  %v1555_v35 = vadd.f32 %v1554_v30, %v1553_v27  ;;  %v1556_v38 = vpop.f32.mrb[86].mxu1 }
 0x455   :  { %v1497_v39 = vpop.f32.mrb[87].mxu0  ;;  %v1557_v40 = vpop.f32.mrb[87].mxu1 }
 0x456   :  { %v1098_v41 = vadd.f32 %v1495_v31, %v2116_v8  ;;  %v1498_v42 = vadd.f32 %v1497_v39, %v1496_v34  ;;  %v1178_v33 = vadd.f32 %v1555_v35, %v2116_v8  ;;  %v1558_v36 = vadd.f32 %v1557_v40, %v1556_v38 }
 0x458   :  { %1194 = vst [vmem:[%s2252_s6 + $0x50] sm:$0xff] %v1098_v41  ;;  %v1101_v37 = vadd.f32 %v1498_v42, %v2116_v8  ;;  %1214 = vst [vmem:[%s2252_s6 + $0xf0] sm:$0xff] %v1178_v33  ;;  %v1181_v43 = vadd.f32 %v1558_v36, %v2116_v8 }
 0x45a   :  { %1195 = vst [vmem:[%s2252_s6 + $0x58] sm:$0xff] %v1101_v37  ;;  %v1499_v45 = vpop.f32.mrb[88].mxu0  ;;  %1215 = vst [vmem:[%s2252_s6 + $0xf8] sm:$0xff] %v1181_v43 }
 0x45b   :  { %v1500_v18 = vpop.f32.mrb[89].mxu0 }
 0x45c   :  { %v1501_v46 = vadd.f32 %v1500_v18, %v1499_v45  ;;  %v1502_v47 = vpop.f32.mrb[90].mxu0 }
 0x45d   :  { %v1503_v48 = vpop.f32.mrb[91].mxu0 }
 0x45e   :  { %v1106_v49 = vadd.f32 %v1501_v46, %v2116_v8  ;;  %v1504_v50 = vadd.f32 %v1503_v48, %v1502_v47 }
 0x460   :  { %1196 = vst [vmem:[%s2252_s6 + $0x60] sm:$0xff] %v1106_v49  ;;  %v1109_v51 = vadd.f32 %v1504_v50, %v2116_v8 }
 0x462   :  { %1197 = vst [vmem:[%s2252_s6 + $0x68] sm:$0xff] %v1109_v51  ;;  %v1505_v52 = vpop.f32.mrb[92].mxu0 }
 0x463   :  { %v1506_v53 = vpop.f32.mrb[93].mxu0 }
 0x464   :  { %v1507_v54 = vadd.f32 %v1506_v53, %v1505_v52  ;;  %v1508_v55 = vpop.f32.mrb[94].mxu0 }
 0x465   :  { %v1509_v56 = vpop.f32.mrb[95].mxu0 }
 0x466   :  { %v1114_v57 = vadd.f32 %v1507_v54, %v2116_v8  ;;  %v1510_v58 = vadd.f32 %v1509_v56, %v1508_v55 }
 0x468   :  { %1198 = vst [vmem:[%s2252_s6 + $0x70] sm:$0xff] %v1114_v57  ;;  %v1117_v59 = vadd.f32 %v1510_v58, %v2116_v8 }
 0x46a   :  { %1199 = vst [vmem:[%s2252_s6 + $0x78] sm:$0xff] %v1117_v59  ;;  %v1511_v60 = vpop.f32.mrb[96].mxu0 }
 0x46b   :  { %v1512_v61 = vpop.f32.mrb[97].mxu0 }
 0x46c   :  { %v1513_v62 = vadd.f32 %v1512_v61, %v1511_v60  ;;  %v1514_v0 = vpop.f32.mrb[98].mxu0 }
 0x46d   :  { %v1515_v1 = vpop.f32.mrb[99].mxu0 }
 0x46e   :  { %v1122_v2 = vadd.f32 %v1513_v62, %v2116_v8  ;;  %v1516_v3 = vadd.f32 %v1515_v1, %v1514_v0 }
 0x470   :  { %1200 = vst [vmem:[%s2252_s6 + $0x80] sm:$0xff] %v1122_v2  ;;  %v1125_v63 = vadd.f32 %v1516_v3, %v2116_v8 }
 0x472   :  { %1201 = vst [vmem:[%s2252_s6 + $0x88] sm:$0xff] %v1125_v63  ;;  %v1517_v5 = vpop.f32.mrb[100].mxu0 }
 0x473   :  { %v1518_v26 = vpop.f32.mrb[101].mxu0 }
 0x474   :  { %v1519_v29 = vadd.f32 %v1518_v26, %v1517_v5  ;;  %v1520_v32 = vpop.f32.mrb[102].mxu0 }
 0x475   :  { %v1521_v44 = vpop.f32.mrb[103].mxu0 }
 0x476   :  { %v1130_v7 = vadd.f32 %v1519_v29, %v2116_v8  ;;  %v1522_v4 = vadd.f32 %v1521_v44, %v1520_v32 }
 0x478   :  { %1202 = vst [vmem:[%s2252_s6 + $0x90] sm:$0xff] %v1130_v7  ;;  %v1133_v6 = vadd.f32 %v1522_v4, %v2116_v8 }
 0x47a   :  { %1203 = vst [vmem:[%s2252_s6 + $0x98] sm:$0xff] %v1133_v6 }

</bundles_post_ra>
